<compile_context>
chip_gen: v5e
topology: v5e:2x2
jax: 0.10.0
libtpu: 0.0.40
codegen_flags: <defaults>
</compile_context>

<pallas_src>
import math

import jax
import jax.numpy as jnp
from jax.experimental import pallas as pl
from jax.experimental.pallas import tpu as pltpu


def make_positional_encoding_table(max_seq_len: int, hidden_size: int) -> jnp.ndarray:
    """Deterministic sin/cos table, identical to the PyTorch __init__."""
    position = jnp.arange(0.0, max_seq_len, dtype=jnp.float32)[:, None]       # (L, 1)
    neg_log_term = -math.log(10000.0) / hidden_size
    div_term = jnp.exp(jnp.arange(0.0, hidden_size, 2, dtype=jnp.float32)
                       * neg_log_term)                                        # (ceil(H/2),)
    angles = position * div_term                                              # (L, ceil(H/2))
    pe = jnp.zeros((max_seq_len, hidden_size), dtype=jnp.float32)
    pe = pe.at[:, 0::2].set(jnp.sin(angles))
    pe_cos = jnp.cos(angles)
    if hidden_size % 2 == 1:
        pe_cos = pe_cos[:, :-1]
    pe = pe.at[:, 1::2].set(pe_cos)
    return pe                                                                  # (L, H)


def _pos_enc_kernel(emb_ref, pe_ref, out_ref):
    # emb_ref / out_ref / pe_ref are all (TR, TC): the batch dim of emb/out is
    # squeezed out by the BlockSpec, so this is a plain 2-D add (no broadcast).
    out_ref[...] = emb_ref[...] + pe_ref[...]


def _round_up(x: int, m: int) -> int:
    return ((x + m - 1) // m) * m


def _round_down(x: int, m: int) -> int:
    return (x // m) * m


def _vmem_capacity_bytes() -> int:
    try:
        return int(pltpu.get_tpu_info().vmem_capacity_bytes)
    except Exception:
        return 64 * 1024 * 1024   # conservative: v7x per-TensorCore VMEM


def positional_encoding_forward(emb: jnp.ndarray, pe: jnp.ndarray,
                                *, donate_emb: bool = False) -> jnp.ndarray:
    """emb: (B, S, H) ; pe: (max_seq_len, H).  Returns emb + pe[:S]."""
    batch, seq_len, hidden = emb.shape
    assert seq_len <= pe.shape[0]

    # Pre-cast pe to the embedding dtype (halves pe HBM/VMEM traffic for bf16,
    # removes a per-grid-step cast).  <=1 ulp vs PyTorch's f32 add for bf16 emb.
    pe_slice = pe[:seq_len].astype(emb.dtype)                                  # (S, H)

    itemsize = jnp.dtype(emb.dtype).itemsize
    sub_unit = 16 if itemsize == 2 else 8      # preferred sublane granularity
    flat = seq_len * hidden

    # ---- choose a lane-dense (rows, cols) view of the (seq, hidden) plane ----
    if hidden % 128 == 0:
        rows, cols = seq_len, hidden                        # already lane-dense
    elif flat % 128 == 0:
        # Re-fold so the last dim is a multiple of 128: sublane- and lane-dense
        # blocks, unmasked full-width stores.
        cols = 128
        for cand in (1024, 768, 512, 384, 256):
            if flat % cand == 0:
                cols = cand
                break
        rows = flat // cols
    else:
        # Truly ragged last dim: keep full-H blocks (allowed since the block
        # last dim equals the array dim); stores on the lane tail are masked.
        rows, cols = seq_len, hidden

    emb_in = emb.reshape(batch, rows, cols)
    pe_in = pe_slice.reshape(rows, cols)

    # ---- tile sizes (cdiv grids; boundary blocks are masked by Pallas) ----
    vmem_cap = _vmem_capacity_bytes()
    # ~4 MiB tiles sit on the ~85% HBM-roofline plateau; 6 buffers * 4 MiB fits
    # v7x's VMEM.  With >=100 MiB VMEM (v5e/v6e) go to 8 MiB to shave step count.
    target_tile_bytes = (8 if vmem_cap >= 100 * 1024 * 1024 else 4) * 1024 * 1024
    max_tile_elems = max(target_tile_bytes // itemsize, sub_unit * 128)

    if cols % 128 == 0:
        tc = 128
        for cand in (512, 384, 256, 128):
            if cols % cand == 0:
                tc = cand
                break
    else:
        tc = cols                                            # full ragged last dim

    tr_cap = max(sub_unit, _round_down(max_tile_elems // tc, sub_unit))
    if rows <= sub_unit:
        tr = rows                                            # full dim (allowed)
    else:
        tr = max(sub_unit, min(tr_cap, _round_down(rows, sub_unit)))

    grid = (pl.cdiv(rows, tr), pl.cdiv(cols, tc), batch)     # batch innermost:
    # pe's block index is constant along it, so the pe tile stays VMEM-resident.

    in_specs = [
        pl.BlockSpec((None, tr, tc), lambda r, c, b: (b, r, c)),   # emb (batch squeezed)
        pl.BlockSpec((tr, tc), lambda r, c, b: (r, c)),            # pe, ignores batch
    ]
    out_spec = pl.BlockSpec((None, tr, tc), lambda r, c, b: (b, r, c))

    # VMEM budget from post-padding block sizes: 2x emb + 2x out + 2x pe + margin,
    # bounded by the generation's physical VMEM (64 MiB v7x / 128 MiB v5e,v6e).
    pad_r = _round_up(tr, sub_unit)
    pad_c = _round_up(tc, 128)
    block_bytes = pad_r * pad_c * itemsize
    need = 6 * block_bytes + 4 * 1024 * 1024
    vmem_limit = int(min(max(need, 32 * 1024 * 1024),
                         max(32 * 1024 * 1024, vmem_cap - 8 * 1024 * 1024)))

    out = pl.pallas_call(
        _pos_enc_kernel,
        out_shape=jax.ShapeDtypeStruct((batch, rows, cols), emb.dtype),
        grid_spec=pltpu.PrefetchScalarGridSpec(
            num_scalar_prefetch=0,
            grid=grid,
            in_specs=in_specs,
            out_specs=out_spec,
        ),
        compiler_params=pltpu.CompilerParams(
            # Pure elementwise: every grid step writes a disjoint output block,
            # so all axes are safely parallel (lets v7x shard across both TCs
            # even when batch is the only large axis).
            dimension_semantics=("parallel", "parallel", "parallel"),
            vmem_limit_bytes=vmem_limit,
        ),
        input_output_aliases=({0: 0} if donate_emb else {}),
    )(emb_in, pe_in)

    return out.reshape(batch, seq_len, hidden)


if __name__ == "__main__":
    max_seq_len = 64
    batch = 2

    # Path 1: hidden % 128 != 0 but (S*H) % 128 == 0 -> re-folded lane/sublane-
    # dense path.  (The module-implied small demo shape.)
    seq_len, hidden = 8, 32
    emb = jax.random.normal(jax.random.PRNGKey(0), (batch, seq_len, hidden),
                            dtype=jnp.float32)
    pe = make_positional_encoding_table(max_seq_len, hidden)
    out = jax.block_until_ready(positional_encoding_forward(emb, pe))
    ref = emb + pe[None, :seq_len, :]
    assert out.shape == (batch, seq_len, hidden)
    assert jnp.allclose(out, ref, atol=1e-6, rtol=1e-6)

    # Path 2: hidden a multiple of 128 -> direct (seq, hidden) tiling.
    seq_len2, hidden2 = 16, 128
    emb2 = jax.random.normal(jax.random.PRNGKey(0), (batch, seq_len2, hidden2),
                             dtype=jnp.float32)
    pe2 = make_positional_encoding_table(max_seq_len, hidden2)
    out2 = jax.block_until_ready(positional_encoding_forward(emb2, pe2))
    ref2 = emb2 + pe2[None, :seq_len2, :]
    assert jnp.allclose(out2, ref2, atol=1e-6, rtol=1e-6)

    # Path 3: ragged/odd hidden -> full-H blocks with masked lane-tail stores
    # (also exercises the odd-hidden pe table construction).
    seq_len3, hidden3 = 7, 33
    emb3 = jax.random.normal(jax.random.PRNGKey(0), (batch, seq_len3, hidden3),
                             dtype=jnp.float32)
    pe3 = make_positional_encoding_table(max_seq_len, hidden3)
    out3 = jax.block_until_ready(positional_encoding_forward(emb3, pe3))
    ref3 = emb3 + pe3[None, :seq_len3, :]
    assert jnp.allclose(out3, ref3, atol=1e-6, rtol=1e-6)

    print("KERNEL_OK")
</pallas_src>

<mosaic_0001>
module attributes {stable_mosaic.version = 11 : i64} {
  func.func @_pos_enc_kernel(%arg0: i32, %arg1: i32, %arg2: i32, %arg3: memref<1x1x256xf32, #tpu.memory_space<vmem>>, %arg4: memref<1x256xf32, #tpu.memory_space<vmem>>, %arg5: memref<1x1x256xf32, #tpu.memory_space<vmem>>) attributes {dimension_semantics = [#tpu.dimension_semantics<parallel>, #tpu.dimension_semantics<parallel>, #tpu.dimension_semantics<parallel>], iteration_bounds = array<i64: 1, 1, 2>, scalar_prefetch = 0 : i64, scratch_operands = 0 : i64, tpu.core_type = #tpu.core_type<tc>, window_params = [{transform_indices = @transform_0, window_bounds = array<i64: 1, 1, 256>}, {transform_indices = @transform_1, window_bounds = array<i64: 1, 256>}, {transform_indices = @transform_2, window_bounds = array<i64: 1, 1, 256>}]} {
    %c0 = arith.constant 0 : index
    %c0_0 = arith.constant 0 : index
    %c0_1 = arith.constant 0 : index
    %0 = vector.load %arg3[%c0, %c0_0, %c0_1] : memref<1x1x256xf32, #tpu.memory_space<vmem>>, vector<1x1x256xf32>
    %1 = vector.shape_cast %0 : vector<1x1x256xf32> to vector<1x256xf32>
    %c0_2 = arith.constant 0 : index
    %c0_3 = arith.constant 0 : index
    %2 = vector.load %arg4[%c0_2, %c0_3] : memref<1x256xf32, #tpu.memory_space<vmem>>, vector<1x256xf32>
    %3 = arith.addf %1, %2 : vector<1x256xf32>
    %c0_4 = arith.constant 0 : index
    %c0_5 = arith.constant 0 : index
    %c0_6 = arith.constant 0 : index
    %4 = vector.load %arg5[%c0_4, %c0_5, %c0_6] : memref<1x1x256xf32, #tpu.memory_space<vmem>>, vector<1x1x256xf32>
    %5 = vector.shape_cast %4 : vector<1x1x256xf32> to vector<1x256xf32>
    %6 = vector.shape_cast %3 : vector<1x256xf32> to vector<1x1x256xf32>
    tpu.vector_store %arg5[%c0_4, %c0_5, %c0_6], %6 {strides = array<i32>} : memref<1x1x256xf32, #tpu.memory_space<vmem>>, vector<1x1x256xf32>,
    return
  }
  func.func @transform_0(%arg0: i32, %arg1: i32, %arg2: i32) -> (i32, i32, i32) {
    %c0_i32 = arith.constant 0 : i32
    return %arg2, %arg0, %arg1 : i32, i32, i32
  }
  func.func @transform_1(%arg0: i32, %arg1: i32, %arg2: i32) -> (i32, i32) {
    %c0_i32 = arith.constant 0 : i32
    return %arg0, %arg1 : i32, i32
  }
  func.func @transform_2(%arg0: i32, %arg1: i32, %arg2: i32) -> (i32, i32, i32) {
    %c0_i32 = arith.constant 0 : i32
    return %arg2, %arg0, %arg1 : i32, i32, i32
  }
}

</mosaic_0001>

<bundles_post_ra>
// kernel: tpu_custom_call.1
= control target key start
LH: loop header
LB: loop body
LE: loop exit
PB: predicated region body
PF: predicated region fallthrough
CT: control target
= control target key end

     0   :  { %7 = vsyncpa [#allocation3], 0  ;;  %s753_s0 = inlined_call_operand.hbm [shape: f32[2,1,256], index: 0, kind: input, shape index: {}]   ;;  %s754_s1 = inlined_call_operand.hbm [shape: f32[1,256], index: 1, kind: input, shape index: {}]   ;;  %s755_s2 = inlined_call_operand.hbm [shape: f32[2,1,256], index: 2, kind: output, shape index: {}]  }
   0x1   :  { %9 = vsyncpa [#allocation3 + $0x1], 0 }
   0x2   :  { %10 = vsyncpa [#allocation6], 0 }
   0x3   :  { %11 = vsyncpa [#allocation4], 0 }
   0x4   :  { %13 = vsyncpa [#allocation4 + $0x1], 0  ;;  %s604_s9 = smov 0   ;;  %s606_s10 = smov 0  }
   0x5   :  { %s608_s11 = smov 0   ;;  %s610_s12 = smov 0  }
   0x6   :  { %s612_s13 = smov 0   ;;  %s614_s14 = smov 0  }
   0x7 LB: > { %s352_s15 = sadd.s32 4294967295, %s586_s14   ;;  %s353_s16 = sadd.s32 4294967294, %s586_s14   ;;  %s586_s14 = sphi %s614_s14, %s19_s14   ;;  %s582_s13 = sphi %s612_s13, %s767_s13   ;;  %s578_s12 = sphi %s610_s12, %s766_s12   ;;  %s574_s11 = sphi %s608_s11, %s765_s11   ;;  %s570_s10 = sphi %s606_s10, %s764_s10   ;;  %s566_s9 = sphi %s604_s9, %s763_s9  }
   0x8   : > { %p62_p0 = scmp.ne.s32.totalorder %s570_s10, %s566_s9  ;;  %p638_p1 = scmp.eq.s32.totalorder %s352_s15, 0 }
   0x9   : > { %p642_p2 = scmp.eq.s32.totalorder %s352_s15, 1  ;;  %p124_p3 = scmp.eq.s32.totalorder %s353_s16, 1 }
   0xa   : > { %p648_p4 = por %p638_p1, %p62_p0  ;;  %p354_p5 = scmp.ge.s32.totalorder %s586_s14, 1 }
   0xb   : > { %p653_p6 = por %p124_p3, %p62_p0  ;;  %p131_p7 = scmp.lt.s32.totalorder %s586_s14, 3 }
   0xc   : > { %s147_s23 = sshll.u32 %s754_s1, 4  ;;  %p356_p9 = scmp.ge.s32.totalorder %s586_s14, 2  ;;  %s148_s23 = int_to_ptr.hbm [resolvable:$true] %s147_s23 }
   0xd   : > { %p661_p8 = pnand %p354_p5, %p131_p7  ;;  %s588_s25 = smov [#allocation5]  }
   0xe   : > { %s149_s26 = sshll.u32 %s588_s25, 4  ;;  %s31_s27 = sadd.s32 1, %s582_s13  ;;  %s150_s26 = int_to_ptr.vmem [resolvable:$true] %s149_s26 }
   0xf   : > { %p375_p10 = pneg %p661_p8  ;;  %p32_p12 = scmp.ge.s32.totalorder %s31_s27, 2 }
  0x10   : > { %s49_s28 = sadd.s32 1, %s574_s11  ;;  %p56_p13 = scmp.ne.s32.totalorder %s574_s11, %s570_s10 }
  0x11   : > { %p376_p11 = pnand %p375_p10, %p638_p1  ;;  %p57_p0 = scmp.eq.s32.totalorder %s586_s14, 0 }
  0x12   : > { %s769_s27 = smov (%p32_p12, %s31_s27), 0  ;;  %p683_p5 = por %p642_p2, %p56_p13 }
  0x13   : > { %378 = dma.hbm_to_vmem [thread:$0]  (!%p376_p11), %s148_s23, 32, %s150_s26, [#allocation6]  }
  0x14   : > { %p677_p3 = por %p57_p0, %p56_p13  ;;  %s42_s3 = ssub.s32 %s582_s13, %s769_s27 }
  0x15   : > { %p388_p7 = scmp.lt.s32.totalorder %s586_s14, 2  ;;  %p47_p10 = scmp.eq.s32.totalorder %s42_s3, 0 }
  0x16   : > { %s160_s4 = sand.u32 1, %s574_s11   ;;  %s358_s7 = sshll.u32 %s582_s13, 1 }
  0x17   : > { %s357_s5 = sshll.u32 %s160_s4, 1  ;;  %s172_s16 = scalar_lea.hbm %s753_s0, %s358_s7 }
  0x18   : > { %s692_s6 = scalar_select %p47_p10, %s574_s11, %s49_s28  }
  0x19   : > { %s164_s21 = scalar_lea.vmem [#allocation2], %s357_s5  ;;  %s174_s18 = sshll.u32 %s172_s16, 4  ;;  %s175_s18 = int_to_ptr.hbm [resolvable:$true] %s174_s18 }
  0x1a   : > { %s176_s22 = sshll.u32 %s164_s21, 4  ;;  %p380_p2 = pnand %p388_p7, %p677_p3  ;;  %s177_s22 = int_to_ptr.vmem [resolvable:$true] %s176_s22 }
  0x1b   : > { %s161_s23 = scalar_lea.sflag [#allocation3], %s160_s4  ;;  %185 = sbr.rel (%p661_p8) target bundleno = 50 (0x32), region = 28 }
  0x1c   : > { %382 = dma.hbm_to_vmem [thread:$0]  (!%p380_p2), %s175_s18, 32, %s177_s22, %s161_s23  }
  0x1d   : > { %s703_s25 = sand.u32 (!%p661_p8), 1, %s570_s10  }
  0x1e   : > { %s360_s26 = sshll.u32 (!%p661_p8), %s703_s25, 1  ;;  %s188_s28 = scalar_lea.sflag (!%p661_p8), [#allocation3], %s703_s25 }
  0x1f   : > { %s191_s3 = scalar_lea.vmem (!%p661_p8), [#allocation2], %s360_s26 }
  0x20   : > { %553 = dma.done.wait (%p648_p4), %s188_s28, 32  }
  0x21   : > { %555 = vsyncadd (%p648_p4), %s188_s28, 4294967264 }
  0x22   : > { %557 = dma.done.wait (%p638_p1), [#allocation6], 32  }
  0x23   : > { %559 = vsyncadd (%p638_p1), [#allocation6], 4294967264  ;;  %s364_s24 = sshll.u32 %s578_s12, 1  ;;  %v224_v0 = vlaneseq  ;;  %s217_s7 = scalar_lea.vmem [#allocation7], %s360_s26  ;;  %v221_v1 = vld [vmem:[%s191_s3] sm:$0x3] }
  0x24   : > { %s244_s5 = scalar_lea.hbm %s755_s2, %s364_s24  ;;  %s246_s8 = sshll.u32 %s217_s7, 4  ;;  %v222_v2 = vld [vmem:[#allocation5] sm:$0x3]  ;;  %s247_s8 = int_to_ptr.vmem [resolvable:$true] %s246_s8 }
  0x25   : > { %s248_s15 = sshll.u32 %s244_s5, 4  ;;  %vm226_vm0 = vcmp.lt.s32.totalorder %v224_v0, 256  ;;  %v223_v3 = vadd.f32 %v222_v2, %v221_v1  ;;  %s230_s17 = scalar_lea.sflag [#allocation4], %s703_s25  ;;  %s249_s15 = int_to_ptr.hbm [resolvable:$true] %s248_s15 }
  0x26   : > { %s514_s19 = sshra.s32 %s249_s15, 4  ;;  %s520_s22 = scalar_lea.hbm %s755_s2, 4  ;;  %s515_s19 = int_to_ptr.hbm [resolvable:$true] %s514_s19 }
  0x27   : > { %228 = vst.msk [vmem:[%s217_s7] sm:$0x3] %vm226_vm0, %v223_v3  ;;  %s516_s12 = scalar_lea.hbm %s515_s19, 2  ;;  %p521_p11 = scmp.lt.s32.totalorder %s515_s19, %s755_s2 }
  0x28   : > { %p517_p1 = scmp.ne.s32.totalorder %s515_s19, %s516_s12  ;;  %p522_p12 = scmp.lt.s32.totalorder %s520_s22, %s516_s12 }
  0x2a   : > { %p518_p4 = pnand %p517_p1, %p683_p5  ;;  %p523_p13 = por %p522_p12, %p521_p11 }
  0x2c   : > { %p519_p8 = pneg %p518_p4 }
  0x2e   : > { %p524_p0 = pnand %p523_p13, %p519_p8 }
  0x30   : > { %527 = shalt.err (!%p524_p0)
}
  0x31   : > { %373 = dma.vmem_to_hbm [thread:$0]  (%p683_p5), %s247_s8, 32, %s249_s15, %s230_s17  }
  0x32 PF: > { %s260_s25 = sand.u32 1, %s566_s9   ;;  %p384_p3 = pnand %p356_p9, %p653_p6 }
  0x33   : > { %s261_s26 = scalar_lea.sflag [#allocation4], %s260_s25 }
  0x34   : > { %p385_p7 = pneg %p384_p3 }
  0x36   : > { %561 = dma.done.wait (%p385_p7), %s261_s26, 32  }
  0x37   : > { %563 = vsyncadd (%p385_p7), %s261_s26, 4294967264  ;;  %s19_s14 = sadd.s32 1, %s586_s14   ;;  %s763_s9 = smov %s570_s10 }
  0x38   : > { %p16_p10 = scmp.ge.s32.totalorder %s19_s14, 4   ;;  %s764_s10 = smov %s574_s11 }
  0x39   : > { %s765_s11 = smov %s692_s6  ;;  %s766_s12 = smov %s582_s13 }
  0x3a   : > { %s767_s13 = smov %s769_s27  ;;  %18 = sbr.rel (!%p16_p10) target bundleno = 7 (0x7), region = 78 }
  0x3f   :  { %267 = vsyncpa [#allocation3], 1 }
  0x40   :  { %269 = vsyncpa [#allocation3 + $0x1], 1 }
  0x41   :  { %270 = vsyncpa [#allocation6], 1 }
  0x42   :  { %271 = vsyncpa [#allocation4], 1 }
  0x43   :  { %273 = vsyncpa [#allocation4 + $0x1], 1 }

</bundles_post_ra>
